<compile_context>
chip_gen: v6e
topology: v6e:2x2x1
jax: 0.10.0
libtpu: 0.0.40
codegen_flags: <defaults>
</compile_context>

<pallas_src>
import functools

import jax
import jax.numpy as jnp
from jax.experimental import pallas as pl
from jax.experimental.pallas import tpu as pltpu


def _round_up(x, m):
    return ((x + m - 1) // m) * m


def _vr_imagebow_kernel(num_words, bert_emb,
                        bow_ref, b1_ref, b2_ref, b3_ref, b4_ref,
                        w_ref, bias_ref, out_ref):
    """out = bow@W[0:nw] + sum_i bert_i@W[nw+i*be : nw+(i+1)*be] + bias."""
    nw, be = num_words, bert_emb
    acc = jnp.dot(bow_ref[...], w_ref[0:nw, :],
                  preferred_element_type=jnp.float32)
    acc = acc + jnp.dot(b1_ref[...], w_ref[nw:nw + be, :],
                        preferred_element_type=jnp.float32)
    acc = acc + jnp.dot(b2_ref[...], w_ref[nw + be:nw + 2 * be, :],
                        preferred_element_type=jnp.float32)
    acc = acc + jnp.dot(b3_ref[...], w_ref[nw + 2 * be:nw + 3 * be, :],
                        preferred_element_type=jnp.float32)
    acc = acc + jnp.dot(b4_ref[...], w_ref[nw + 3 * be:nw + 4 * be, :],
                        preferred_element_type=jnp.float32)
    out_ref[...] = (acc + bias_ref[...]).astype(out_ref.dtype)


def fold_vr_imagebow_params(w_img, b_img, wc_vis, wc_txt, bc, num_answers=4):
    """One-time host-side weight folding (not per-call work).

    w_img:  (num_words, img_space)  image projection weight, (in, out) layout
    b_img:  (1, img_space)          image projection bias
    wc_vis: (img_space, 1)          classifier weight, vis_emb slice
    wc_txt: (bert_emb, 1)           classifier weight, bert slice
    bc:     (1, 1)                  classifier bias

    Returns (w_comb, bias_row) with
      w_comb:   (num_words + num_answers*bert_emb, num_answers)
      bias_row: (1, num_answers)
    such that scores = [bow | bert_1..bert_A] @ w_comb + bias_row.
    """
    w_eff = w_img @ wc_vis                                    # (num_words, 1)
    bias_eff = b_img @ wc_vis + bc                            # (1, 1)
    top = jnp.tile(w_eff, (1, num_answers))                   # shared vis part
    blk = jnp.kron(jnp.eye(num_answers, dtype=wc_txt.dtype), wc_txt)
    w_comb = jnp.concatenate([top, blk], axis=0).astype(jnp.float32)
    bias_row = jnp.tile(bias_eff, (1, num_answers)).astype(jnp.float32)
    return w_comb, bias_row


def vr_image_bow(bow, bert1, bert2, bert3, bert4, w_comb, bias_row,
                 *, batch_tile=2048):
    """Fused VR_ImageBOW forward. Returns (B, num_answers) answer scores."""
    bow = bow.astype(jnp.float32)
    bert1 = bert1.astype(jnp.float32)
    bert2 = bert2.astype(jnp.float32)
    bert3 = bert3.astype(jnp.float32)
    bert4 = bert4.astype(jnp.float32)

    B, num_words = bow.shape
    bert_emb = bert1.shape[1]
    k_total, num_answers = w_comb.shape
    assert k_total == num_words + 4 * bert_emb, (k_total, num_words, bert_emb)

    # Batch tile: multiple of 8 (f32 sublane), capped by batch_tile (VMEM
    # budget: ~6 KiB/row double-buffered with lane padding -> ~12 MiB at 2048,
    # safe under v5e's 16 MiB / v7x's 32 MiB default scoped VMEM), and sized
    # so large batches give >= 4 grid steps for v7x megacore sharding.
    cap = max(8, (batch_tile // 8) * 8)
    tb = min(cap, max(8, _round_up(pl.cdiv(B, 4), 8)))
    grid = (pl.cdiv(B, tb),)

    kernel = functools.partial(_vr_imagebow_kernel, num_words, bert_emb)

    return pl.pallas_call(
        kernel,
        out_shape=jax.ShapeDtypeStruct((B, num_answers), jnp.float32),
        grid_spec=pltpu.PrefetchScalarGridSpec(
            num_scalar_prefetch=0,
            grid=grid,
            in_specs=[
                pl.BlockSpec((tb, num_words), lambda i: (i, 0)),     # bow
                pl.BlockSpec((tb, bert_emb), lambda i: (i, 0)),      # bert1
                pl.BlockSpec((tb, bert_emb), lambda i: (i, 0)),      # bert2
                pl.BlockSpec((tb, bert_emb), lambda i: (i, 0)),      # bert3
                pl.BlockSpec((tb, bert_emb), lambda i: (i, 0)),      # bert4
                pl.BlockSpec((k_total, num_answers), lambda i: (0, 0)),
                pl.BlockSpec((1, num_answers), lambda i: (0, 0)),
            ],
            out_specs=pl.BlockSpec((tb, num_answers), lambda i: (i, 0)),
        ),
        compiler_params=pltpu.CompilerParams(
            dimension_semantics=("parallel",)),
    )(bow, bert1, bert2, bert3, bert4, w_comb, bias_row)


def vr_image_bow_ref(bow, bert1, bert2, bert3, bert4,
                     w_img, b_img, wc_vis, wc_txt, bc):
    """Pure-JAX reference matching the original PyTorch math."""
    vis = bow @ w_img + b_img
    w_cls = jnp.concatenate([wc_vis, wc_txt], axis=0)

    def score(bert):
        emb = jnp.concatenate([vis, bert], axis=1)
        return emb @ w_cls + bc

    return jnp.concatenate(
        [score(bert1), score(bert2), score(bert3), score(bert4)], axis=1)


if __name__ == "__main__":
    # small shapes consistent with the module
    B = 8            # batch
    num_words = 32   # BOW vocab size
    img_space = 16   # args.img_space
    bert_emb = 32    # args.bert_emb_size

    key = jax.random.PRNGKey(0)
    ks = jax.random.split(key, 10)

    # inputs
    bow = jax.random.normal(ks[0], (B, num_words), dtype=jnp.float32)
    bert1 = jax.random.normal(ks[1], (B, bert_emb), dtype=jnp.float32)
    bert2 = jax.random.normal(ks[2], (B, bert_emb), dtype=jnp.float32)
    bert3 = jax.random.normal(ks[3], (B, bert_emb), dtype=jnp.float32)
    bert4 = jax.random.normal(ks[4], (B, bert_emb), dtype=jnp.float32)

    # deterministic synthetic parameters (PyTorch-style uniform init scale)
    lim_img = 1.0 / jnp.sqrt(num_words)
    w_img = jax.random.uniform(ks[5], (num_words, img_space),
                               minval=-lim_img, maxval=lim_img,
                               dtype=jnp.float32)             # (in, out) layout
    b_img = jax.random.uniform(ks[6], (1, img_space),
                               minval=-lim_img, maxval=lim_img,
                               dtype=jnp.float32)

    lim_cls = 1.0 / jnp.sqrt(img_space + bert_emb)
    wc_vis = jax.random.uniform(ks[7], (img_space, 1),
                                minval=-lim_cls, maxval=lim_cls,
                                dtype=jnp.float32)            # classifier, vis part
    wc_txt = jax.random.uniform(ks[8], (bert_emb, 1),
                                minval=-lim_cls, maxval=lim_cls,
                                dtype=jnp.float32)            # classifier, bert part
    bc = jax.random.uniform(ks[9], (1, 1),
                            minval=-lim_cls, maxval=lim_cls,
                            dtype=jnp.float32)

    # one-time weight folding (host side)
    w_comb, bias_row = fold_vr_imagebow_params(w_img, b_img, wc_vis, wc_txt, bc)

    out = vr_image_bow(bow, bert1, bert2, bert3, bert4, w_comb, bias_row)
    out = jax.block_until_ready(out)

    ref = vr_image_bow_ref(bow, bert1, bert2, bert3, bert4,
                           w_img, b_img, wc_vis, wc_txt, bc)
    assert out.shape == (B, 4), out.shape
    assert jnp.allclose(out, ref, atol=2e-5, rtol=1e-5), (out, ref)

    print("KERNEL_OK")
</pallas_src>

<mosaic_0001>
module attributes {stable_mosaic.version = 11 : i64} {
  func.func @_vr_imagebow_kernel(%arg0: i32, %arg1: memref<8x32xf32, #tpu.memory_space<vmem>>, %arg2: memref<8x32xf32, #tpu.memory_space<vmem>>, %arg3: memref<8x32xf32, #tpu.memory_space<vmem>>, %arg4: memref<8x32xf32, #tpu.memory_space<vmem>>, %arg5: memref<8x32xf32, #tpu.memory_space<vmem>>, %arg6: memref<160x4xf32, #tpu.memory_space<vmem>>, %arg7: memref<1x4xf32, #tpu.memory_space<vmem>>, %arg8: memref<8x4xf32, #tpu.memory_space<vmem>>) attributes {dimension_semantics = [#tpu.dimension_semantics<parallel>], iteration_bounds = array<i64: 1>, scalar_prefetch = 0 : i64, scratch_operands = 0 : i64, tpu.core_type = #tpu.core_type<tc>, window_params = [{transform_indices = @transform_0, window_bounds = array<i64: 8, 32>}, {transform_indices = @transform_1, window_bounds = array<i64: 8, 32>}, {transform_indices = @transform_2, window_bounds = array<i64: 8, 32>}, {transform_indices = @transform_3, window_bounds = array<i64: 8, 32>}, {transform_indices = @transform_4, window_bounds = array<i64: 8, 32>}, {pipeline_mode = #tpu.pipeline_mode<synchronous>, transform_indices = @transform_5, window_bounds = array<i64: 160, 4>}, {pipeline_mode = #tpu.pipeline_mode<synchronous>, transform_indices = @transform_6, window_bounds = array<i64: 1, 4>}, {transform_indices = @transform_7, window_bounds = array<i64: 8, 4>}]} {
    %c0 = arith.constant 0 : index
    %c0_0 = arith.constant 0 : index
    %0 = vector.load %arg1[%c0, %c0_0] : memref<8x32xf32, #tpu.memory_space<vmem>>, vector<8x32xf32>
    %c0_1 = arith.constant 0 : index
    %c0_2 = arith.constant 0 : index
    %1 = vector.load %arg6[%c0_1, %c0_2] : memref<160x4xf32, #tpu.memory_space<vmem>>, vector<32x4xf32>
    %cst = arith.constant dense<0.000000e+00> : vector<8x4xf32>
    %2 = tpu.matmul %0, %1, %cst {dimension_numbers = #tpu.dot_dimension_numbers<[1], [0], [0], [1], [0, 0, 1, 1], [], []>} : vector<8x32xf32>, vector<32x4xf32>, vector<8x4xf32> -> vector<8x4xf32>
    %c0_3 = arith.constant 0 : index
    %c0_4 = arith.constant 0 : index
    %3 = vector.load %arg2[%c0_3, %c0_4] : memref<8x32xf32, #tpu.memory_space<vmem>>, vector<8x32xf32>
    %c32 = arith.constant 32 : index
    %c0_5 = arith.constant 0 : index
    %4 = vector.load %arg6[%c32, %c0_5] : memref<160x4xf32, #tpu.memory_space<vmem>>, vector<32x4xf32>
    %cst_6 = arith.constant dense<0.000000e+00> : vector<8x4xf32>
    %5 = tpu.matmul %3, %4, %cst_6 {dimension_numbers = #tpu.dot_dimension_numbers<[1], [0], [0], [1], [0, 0, 1, 1], [], []>} : vector<8x32xf32>, vector<32x4xf32>, vector<8x4xf32> -> vector<8x4xf32>
    %6 = arith.addf %2, %5 : vector<8x4xf32>
    %c0_7 = arith.constant 0 : index
    %c0_8 = arith.constant 0 : index
    %7 = vector.load %arg3[%c0_7, %c0_8] : memref<8x32xf32, #tpu.memory_space<vmem>>, vector<8x32xf32>
    %c64 = arith.constant 64 : index
    %c0_9 = arith.constant 0 : index
    %8 = vector.load %arg6[%c64, %c0_9] : memref<160x4xf32, #tpu.memory_space<vmem>>, vector<32x4xf32>
    %cst_10 = arith.constant dense<0.000000e+00> : vector<8x4xf32>
    %9 = tpu.matmul %7, %8, %cst_10 {dimension_numbers = #tpu.dot_dimension_numbers<[1], [0], [0], [1], [0, 0, 1, 1], [], []>} : vector<8x32xf32>, vector<32x4xf32>, vector<8x4xf32> -> vector<8x4xf32>
    %10 = arith.addf %6, %9 : vector<8x4xf32>
    %c0_11 = arith.constant 0 : index
    %c0_12 = arith.constant 0 : index
    %11 = vector.load %arg4[%c0_11, %c0_12] : memref<8x32xf32, #tpu.memory_space<vmem>>, vector<8x32xf32>
    %c96 = arith.constant 96 : index
    %c0_13 = arith.constant 0 : index
    %12 = vector.load %arg6[%c96, %c0_13] : memref<160x4xf32, #tpu.memory_space<vmem>>, vector<32x4xf32>
    %cst_14 = arith.constant dense<0.000000e+00> : vector<8x4xf32>
    %13 = tpu.matmul %11, %12, %cst_14 {dimension_numbers = #tpu.dot_dimension_numbers<[1], [0], [0], [1], [0, 0, 1, 1], [], []>} : vector<8x32xf32>, vector<32x4xf32>, vector<8x4xf32> -> vector<8x4xf32>
    %14 = arith.addf %10, %13 : vector<8x4xf32>
    %c0_15 = arith.constant 0 : index
    %c0_16 = arith.constant 0 : index
    %15 = vector.load %arg5[%c0_15, %c0_16] : memref<8x32xf32, #tpu.memory_space<vmem>>, vector<8x32xf32>
    %c128 = arith.constant 128 : index
    %c0_17 = arith.constant 0 : index
    %16 = vector.load %arg6[%c128, %c0_17] : memref<160x4xf32, #tpu.memory_space<vmem>>, vector<32x4xf32>
    %cst_18 = arith.constant dense<0.000000e+00> : vector<8x4xf32>
    %17 = tpu.matmul %15, %16, %cst_18 {dimension_numbers = #tpu.dot_dimension_numbers<[1], [0], [0], [1], [0, 0, 1, 1], [], []>} : vector<8x32xf32>, vector<32x4xf32>, vector<8x4xf32> -> vector<8x4xf32>
    %18 = arith.addf %14, %17 : vector<8x4xf32>
    %c0_19 = arith.constant 0 : index
    %c0_20 = arith.constant 0 : index
    %19 = vector.load %arg7[%c0_19, %c0_20] : memref<1x4xf32, #tpu.memory_space<vmem>>, vector<1x4xf32>
    %20 = vector.broadcast %19 : vector<1x4xf32> to vector<8x4xf32>
    %21 = arith.addf %18, %20 : vector<8x4xf32>
    %c0_21 = arith.constant 0 : index
    %c0_22 = arith.constant 0 : index
    %22 = vector.load %arg8[%c0_21, %c0_22] : memref<8x4xf32, #tpu.memory_space<vmem>>, vector<8x4xf32>
    tpu.vector_store %arg8[%c0_21, %c0_22], %21 {strides = array<i32>} : memref<8x4xf32, #tpu.memory_space<vmem>>, vector<8x4xf32>,
    return
  }
  func.func @transform_0(%arg0: i32) -> (i32, i32) {
    %c0_i32 = arith.constant 0 : i32
    %c0_i32_0 = arith.constant 0 : i32
    return %arg0, %c0_i32 : i32, i32
  }
  func.func @transform_1(%arg0: i32) -> (i32, i32) {
    %c0_i32 = arith.constant 0 : i32
    %c0_i32_0 = arith.constant 0 : i32
    return %arg0, %c0_i32 : i32, i32
  }
  func.func @transform_2(%arg0: i32) -> (i32, i32) {
    %c0_i32 = arith.constant 0 : i32
    %c0_i32_0 = arith.constant 0 : i32
    return %arg0, %c0_i32 : i32, i32
  }
  func.func @transform_3(%arg0: i32) -> (i32, i32) {
    %c0_i32 = arith.constant 0 : i32
    %c0_i32_0 = arith.constant 0 : i32
    return %arg0, %c0_i32 : i32, i32
  }
  func.func @transform_4(%arg0: i32) -> (i32, i32) {
    %c0_i32 = arith.constant 0 : i32
    %c0_i32_0 = arith.constant 0 : i32
    return %arg0, %c0_i32 : i32, i32
  }
  func.func @transform_5(%arg0: i32) -> (i32, i32) {
    %c0_i32 = arith.constant 0 : i32
    %c0_i32_0 = arith.constant 0 : i32
    %c0_i32_1 = arith.constant 0 : i32
    return %c0_i32, %c0_i32_0 : i32, i32
  }
  func.func @transform_6(%arg0: i32) -> (i32, i32) {
    %c0_i32 = arith.constant 0 : i32
    %c0_i32_0 = arith.constant 0 : i32
    %c0_i32_1 = arith.constant 0 : i32
    return %c0_i32, %c0_i32_0 : i32, i32
  }
  func.func @transform_7(%arg0: i32) -> (i32, i32) {
    %c0_i32 = arith.constant 0 : i32
    %c0_i32_0 = arith.constant 0 : i32
    return %arg0, %c0_i32 : i32, i32
  }
}

</mosaic_0001>

<bundles_post_ra>
// kernel: tpu_custom_call.1
= control target key start
LH: loop header
LB: loop body
LE: loop exit
PB: predicated region body
PF: predicated region fallthrough
CT: control target
= control target key end

     0   :  { %v522_v0 = vmov 0.0   ;;  %vm36_vm0 = vcmask 261120   ;;  %vm523_vm1 = vmmov 0   ;;  %vm428_vm2 = vcmask 31744   ;;  %s680_s5 = inlined_call_operand.vmem [shape: f32[160,4], index: 5, kind: input, shape index: {}]   ;;  %s681_s1 = inlined_call_operand.vmem [shape: f32[8,32], index: 1, kind: input, shape index: {}]   ;;  %s682_s0 = inlined_call_operand.vmem [shape: f32[8,32], index: 0, kind: input, shape index: {}]   ;;  %s683_s2 = inlined_call_operand.vmem [shape: f32[8,32], index: 2, kind: input, shape index: {}]   ;;  %s684_s3 = inlined_call_operand.vmem [shape: f32[8,32], index: 3, kind: input, shape index: {}]   ;;  %s685_s4 = inlined_call_operand.vmem [shape: f32[8,32], index: 4, kind: input, shape index: {}]   ;;  %s686_s6 = inlined_call_operand.vmem [shape: f32[1,4], index: 6, kind: input, shape index: {}]   ;;  %s687_s7 = inlined_call_operand.vmem [shape: f32[8,4], index: 7, kind: output, shape index: {}]  }
   0x1   :  { %465 = vmatprep.subr.mxu0 %v522_v0  ;;  %v35_v1 = vld [vmem:[%s680_s5 + $0x38] sm:$0xff]  ;;  %476 = vmatprep.subr.mxu1 %v522_v0  ;;  %v34_v3 = vld [vmem:[%s680_s5 + $0x30] sm:$0xff]  ;;  %v33_v5 = vld [vmem:[%s680_s5 + $0x28] sm:$0xff] }
   0x2   :  { %v30_v2 = vld [vmem:[%s680_s5 + $0x18] sm:$0xff]  ;;  %466 = vmatpush3.msra.mxu0 %v35_v1  ;;  %v29_v4 = vld [vmem:[%s680_s5 + $0x10] sm:$0xff]  ;;  %v28_v6 = vld [vmem:[%s680_s5 + $0x8] sm:$0xff]  ;;  %473 = vmatprep.mubr.msk.f32.mxu0 %vm523_vm1, %v522_v0 }
   0x3   :  { %477 = vmatpush3.msra.mxu1 %v30_v2  ;;  %467 = vmatprep.subr.mxu0 %v522_v0  ;;  %v32_v7 = vld [vmem:[%s680_s5 + $0x20] sm:$0xff]  ;;  %v187_v11 = vld [vmem:[%s680_s5 + $0x58] sm:$0xff]  ;;  %v186_v12 = vld [vmem:[%s680_s5 + $0x50] sm:$0xff] }
   0x4   :  { %478 = vmatprep.subr.mxu1 %v522_v0  ;;  %468 = vmatpush3.msra.mxu0 %v34_v3  ;;  %v31_v8 = vld [vmem:[%s681_s1] sm:$0xff]  ;;  %v266_v13 = vld [vmem:[%s680_s5 + $0x78] sm:$0xff]  ;;  %v185_v14 = vld [vmem:[%s680_s5 + $0x48] sm:$0xff] }
   0x5   :  { %479 = vmatpush3.msra.mxu1 %v29_v4  ;;  %469 = vmatprep.subr.mxu0 %v522_v0  ;;  %v27_v9 = vld [vmem:[%s680_s5] sm:$0xff]  ;;  %v265_v15 = vld [vmem:[%s680_s5 + $0x70] sm:$0xff]  ;;  %v264_v17 = vld [vmem:[%s680_s5 + $0x68] sm:$0xff] }
   0x6   :  { %480 = vmatprep.subr.mxu1 %v522_v0  ;;  %470 = vmatpush3.msra.mxu0 %v33_v5  ;;  %v26_v10 = vld [vmem:[%s682_s0] sm:$0xff]  ;;  %v345_v20 = vld [vmem:[%s680_s5 + $0x98] sm:$0xff]  ;;  %v344_v22 = vld [vmem:[%s680_s5 + $0x90] sm:$0xff] }
   0x7   :  { %481 = vmatpush3.msra.mxu1 %v28_v6  ;;  %471 = vmatprep.subr.mxu0 %v522_v0  ;;  %v184_v16 = vld [vmem:[%s680_s5 + $0x40] sm:$0xff]  ;;  %v343_v23 = vld [vmem:[%s680_s5 + $0x88] sm:$0xff] }
   0x8   :  { %472 = vmatpush3.msra.mxu0 %v32_v7  ;;  %482 = vmatprep.subr.mxu1 %v522_v0  ;;  %v183_v18 = vld [vmem:[%s683_s2] sm:$0xff] }
   0x9   :  { %474 = vmatmul.mubr.msk.f32.vlgmr.msra.gmra.mxu0 %vm36_vm0, %v31_v8  ;;  %483 = vmatpush3.msra.mxu1 %v27_v9  ;;  %v263_v19 = vld [vmem:[%s680_s5 + $0x60] sm:$0xff] }
   0xa   :  { %484 = vmatprep.mubr.msk.f32.mxu1 %vm523_vm1, %v522_v0  ;;  %487 = vmatprep.subr.mxu0 %v522_v0  ;;  %v262_v21 = vld [vmem:[%s684_s3] sm:$0xff] }
   0xb   :  { %485 = vmatmul.mubr.msk.f32.vlgmr.msra.gmra.mxu1 %vm36_vm0, %v26_v10  ;;  %488 = vmatpush3.msra.mxu0 %v187_v11  ;;  %v342_v24 = vld [vmem:[%s680_s5 + $0x80] sm:$0xff] }
   0xc   :  { %489 = vmatprep.subr.mxu0 %v522_v0  ;;  %498 = vmatprep.subr.mxu1 %v522_v0  ;;  %v341_v25 = vld [vmem:[%s685_s4] sm:$0xff] }
   0xd   :  { %490 = vmatpush3.msra.mxu0 %v186_v12  ;;  %499 = vmatpush3.msra.mxu1 %v266_v13  ;;  %v439_v38 = vld [vmem:[%s686_s6] ss:$0 sm:$0xff] }
   0xe   :  { %491 = vmatprep.subr.mxu0 %v522_v0  ;;  %500 = vmatprep.subr.mxu1 %v522_v0 }
   0xf   :  { %492 = vmatpush3.msra.mxu0 %v185_v14  ;;  %501 = vmatpush3.msra.mxu1 %v265_v15 }
  0x10   :  { %493 = vmatprep.subr.mxu0 %v522_v0  ;;  %502 = vmatprep.subr.mxu1 %v522_v0 }
  0x11   :  { %494 = vmatpush3.msra.mxu0 %v184_v16  ;;  %495 = vmatprep.mubr.msk.f32.mxu0 %vm523_vm1, %v522_v0 }
  0x12   :  { %503 = vmatpush3.msra.mxu1 %v264_v17  ;;  %496 = vmatmul.mubr.msk.f32.vlgmr.msra.gmra.mxu0 %vm36_vm0, %v183_v18 }
  0x13   :  { %504 = vmatprep.subr.mxu1 %v522_v0  ;;  %509 = vmatprep.subr.mxu0 %v522_v0 }
  0x14   :  { %505 = vmatpush3.msra.mxu1 %v263_v19  ;;  %506 = vmatprep.mubr.msk.f32.mxu1 %vm523_vm1, %v522_v0 }
  0x15   :  { %510 = vmatpush3.msra.mxu0 %v345_v20  ;;  %507 = vmatmul.mubr.msk.f32.vlgmr.msra.gmra.mxu1 %vm36_vm0, %v262_v21 }
  0x16   :  { %511 = vmatprep.subr.mxu0 %v522_v0  ;;  %517 = vmatprep.mubr.msk.f32.mxu0 %vm523_vm1, %v522_v0 }
  0x17   :  { %512 = vmatpush3.msra.mxu0 %v344_v22 }
  0x18   :  { %513 = vmatprep.subr.mxu0 %v522_v0 }
  0x19   :  { %514 = vmatpush3.msra.mxu0 %v343_v23 }
  0x1a   :  { %515 = vmatprep.subr.mxu0 %v522_v0 }
  0x1b   :  { %516 = vmatpush3.msra.mxu0 %v342_v24 }
  0x1c   :  { %518 = vmatmul.mubr.msk.f32.vlgmr.msra.gmra.mxu0 %vm36_vm0, %v341_v25 }
  0xc9   :  { %v106_v26 = vpop.f32.mrf.mxu0 }
  0xcb   :  { %v179_v27 = vpop.f32.mrf.mxu1  ;;  %v475_v28 = vpop.f32.mrf.mxu0 }
  0xcc   :  { %v180_v32 = vadd.f32 %v179_v27, %v106_v26 }
  0xcd   :  { %v486_v29 = vpop.f32.mrf.mxu1 }
  0xd2   :  { %v257_v30 = vpop.f32.mrf.mxu0 }
  0xd3   :  { %v261_v34 = vadd.f32 %v257_v30, %v180_v32 }
  0xd4   :  { %v497_v31 = vpop.f32.mrf.mxu0 }
  0xd5   :  { %v336_v33 = vpop.f32.mrf.mxu1 }
  0xd6   :  { %v340_v36 = vadd.f32 %v336_v33, %v261_v34 }
  0xd7   :  { %v508_v35 = vpop.f32.mrf.mxu1 }
  0xdc   :  { %v415_v37 = vpop.f32.mrf.mxu0 }
  0xdd   :  { %v419_v39 = vadd.f32 %v415_v37, %v340_v36 }
  0xde   :  { %v519_v40 = vpop.f32.mrf.mxu0 }
  0xdf   :  { %v427_v41 = vadd.f32 %v439_v38, %v419_v39 }
  0xe1   :  { %429 = vst.msk [vmem:[%s687_s7] sm:$0xff] %vm428_vm2, %v427_v41 }

</bundles_post_ra>
